<compile_context>
chip_gen: v5e
topology: v5e:2x2
jax: 0.10.0
libtpu: 0.0.40
codegen_flags: <defaults>
</compile_context>

<pallas_src>
import functools

import jax
import jax.numpy as jnp
from jax.experimental import pallas as pl
from jax.experimental.pallas import tpu as pltpu


# ----------------------------- parameter glue ------------------------------ #

def gauss2d_params(channels, kernel_size, alpha, sigma):
    """Build the separable 1-D taps and the full 2-D depthwise weight.

    Matches utils/model.py: radial_kernel uses torch.meshgrid(..., indexing='xy'),
    so for kernel_size=(k0, k1) the weight's spatial shape is (k1, k0) (height
    taps come from linspace(k1), width taps from linspace(k0)).  Since
    exp(-(gx^2+gy^2)/(2s^2)) = exp(-gy^2/..)*exp(-gx^2/..), the 2-D Gaussian is
    an exact outer product of the 1-D taps.  Normalization divides by the sum
    over the full (C,1,k1,k0) stack, i.e. channels * sum(w2d), as in the module.
    """
    k0, k1 = kernel_size
    lin0 = jnp.linspace(-(k0 - 1) / 2.0, (k0 - 1) / 2.0, k0, dtype=jnp.float32)
    lin1 = jnp.linspace(-(k1 - 1) / 2.0, (k1 - 1) / 2.0, k1, dtype=jnp.float32)
    g0 = jnp.exp(-(lin0 ** 2) / (2.0 * sigma ** 2))   # width taps  (weight axis -1)
    g1 = jnp.exp(-(lin1 ** 2) / (2.0 * sigma ** 2))   # height taps (weight axis -2)
    w2d = g1[:, None] * g0[None, :]                   # (k1, k0) per-channel kernel
    scale = alpha / (channels * jnp.sum(w2d))         # full-stack normalization
    weight = jnp.broadcast_to((scale * w2d)[None, None], (channels, 1, k1, k0))
    wh = g1.astype(jnp.float32)                       # H-pass taps (kh,)
    ww = (scale * g0).astype(jnp.float32)             # W-pass taps (kw,), scale folded
    return wh, ww, weight.astype(jnp.float32)


# ------------------------------ Pallas kernel ------------------------------ #

def _gauss2d_kernel(wh_ref, ww_ref, x_ref, o_ref, xpad_ref, tpad_ref,
                    *, C, H, W, kh, kw):
    """One grid step = one image n: depthwise separable Gaussian on (C, H*W).

    wh_ref  : SMEM (kh,)        channel-invariant height taps (scalars).
    ww_ref  : VMEM (kw, H*W)    masked per-lane width taps (zeros at positions
                                where the shifted read would cross a W-row).
    x_ref   : VMEM (C, H*W)     flattened input planes for image n.
    o_ref   : VMEM (C, H*W)     flattened output planes for image n.
    xpad_ref: VMEM (C, (H+kh-1)*W)  H-padded scratch (zero pad rows).
    tpad_ref: VMEM (C, H*W+kw-1)    W-padded scratch for the second pass.
    """
    HW = H * W
    ph = (kh - 1) // 2
    pw = (kw - 1) // 2

    # --- zero 'same' padding along H, built inside VMEM (no HBM pad op) ------
    if ph > 0:
        xpad_ref[:, pl.ds(0, ph * W)] = jnp.zeros((C, ph * W), jnp.float32)
    if (kh - 1 - ph) > 0:
        xpad_ref[:, pl.ds(ph * W + HW, (kh - 1 - ph) * W)] = jnp.zeros(
            (C, (kh - 1 - ph) * W), jnp.float32)
    xpad_ref[:, pl.ds(ph * W, HW)] = x_ref[...]

    # --- H pass: kh scalar taps; an H-shift is a static lane-slice offset i*W -
    acc = jnp.zeros((C, HW), jnp.float32)
    for i in range(kh):
        acc = acc + wh_ref[i] * xpad_ref[:, pl.ds(i * W, HW)]

    # --- zero 'same' padding along W (flat layout: shift by 1) ---------------
    if pw > 0:
        tpad_ref[:, pl.ds(0, pw)] = jnp.zeros((C, pw), jnp.float32)
    if (kw - 1 - pw) > 0:
        tpad_ref[:, pl.ds(pw + HW, kw - 1 - pw)] = jnp.zeros(
            (C, kw - 1 - pw), jnp.float32)
    tpad_ref[:, pl.ds(pw, HW)] = acc

    # --- W pass: masked tap rows zero out cross-row contamination ------------
    out = jnp.zeros((C, HW), jnp.float32)
    for j in range(kw):
        out = out + ww_ref[pl.ds(j, 1), :] * tpad_ref[:, pl.ds(j, HW)]

    o_ref[...] = out.astype(o_ref.dtype)


def gauss2d_forward(x, wh, ww, kernel_hw):
    """x: (N, C, H, W) f32; wh: (kh,) height taps; ww: (kw,) width taps."""
    N, C, H, W = x.shape
    kh, kw = kernel_hw
    HW = H * W
    pw = (kw - 1) // 2

    # Free (contiguous) reshape to the lane-dense flat layout.
    xf = x.reshape(N, C, HW)

    # Masked per-lane width-tap table: ww_tbl[j, p] = ww[j] if the read at
    # lane p+j-pw stays inside the same W-row, else 0 (encodes 'same' padding
    # and prevents cross-row bleed in the flat layout).
    wpos = jnp.arange(HW, dtype=jnp.int32) % W                     # (HW,)
    src = wpos[None, :] + (jnp.arange(kw, dtype=jnp.int32)[:, None] - pw)
    ww_tbl = jnp.where((src >= 0) & (src < W), ww[:, None], 0.0)
    ww_tbl = ww_tbl.astype(jnp.float32)                            # (kw, HW)

    kern = functools.partial(_gauss2d_kernel, C=C, H=H, W=W, kh=kh, kw=kw)

    out = pl.pallas_call(
        kern,
        out_shape=jax.ShapeDtypeStruct((N, C, HW), x.dtype),
        grid=(N,),
        in_specs=[
            # kh channel-invariant scalar taps live in SMEM.
            pl.BlockSpec(memory_space=pltpu.MemorySpace.SMEM),
            # Masked width-tap table, same block every step.
            pl.BlockSpec((kw, HW), lambda n: (0, 0)),
            # One full (C, H*W) slab per image n.
            pl.BlockSpec((pl.Squeezed(), C, HW), lambda n: (n, 0, 0)),
        ],
        out_specs=pl.BlockSpec((pl.Squeezed(), C, HW), lambda n: (n, 0, 0)),
        scratch_shapes=[
            pltpu.VMEM((C, (H + kh - 1) * W), jnp.float32),  # H-padded input
            pltpu.VMEM((C, HW + kw - 1), jnp.float32),       # W-padded mid result
        ],
        compiler_params=pltpu.CompilerParams(
            dimension_semantics=("parallel",),
        ),
    )(wh.astype(jnp.float32), ww_tbl, xf)

    return out.reshape(N, C, H, W)


# ---------------------------------- main ----------------------------------- #

if __name__ == "__main__":
    # Deterministic module "parameters" (the module would draw random(); fixed).
    channels = 4
    kernel_size = (5, 5)
    alpha = 0.75
    sigma = 0.60

    wh, ww, weight = gauss2d_params(channels, kernel_size, alpha, sigma)
    kh, kw = weight.shape[-2], weight.shape[-1]

    # Deterministic input, NCHW like the PyTorch module.
    key = jax.random.PRNGKey(0)
    x = jax.random.normal(key, (2, channels, 16, 16), dtype=jnp.float32)

    out = gauss2d_forward(x, wh, ww, (kh, kw))
    out = jax.block_until_ready(out)

    # Cross-check against XLA's grouped conv (same semantics as torch conv2d
    # with padding='same' for odd kernels).
    expected = jax.lax.conv_general_dilated(
        x,
        weight,
        window_strides=(1, 1),
        padding="SAME",
        dimension_numbers=("NCHW", "OIHW", "NCHW"),
        feature_group_count=channels,
        precision=jax.lax.Precision.HIGHEST,
    )
    assert out.shape == (2, channels, 16, 16)
    assert jnp.allclose(out, expected, atol=1e-5, rtol=1e-5)

    print("KERNEL_OK")
</pallas_src>

<mosaic_0001>
module attributes {stable_mosaic.version = 11 : i64} {
  func.func @_gauss2d_kernel(%arg0: i32, %arg1: memref<5xf32, #tpu.memory_space<smem>>, %arg2: memref<5x256xf32, #tpu.memory_space<vmem>>, %arg3: memref<1x4x256xf32, #tpu.memory_space<vmem>>, %arg4: memref<1x4x256xf32, #tpu.memory_space<vmem>>, %arg5: memref<4x320xf32, #tpu.memory_space<vmem>>, %arg6: memref<4x260xf32, #tpu.memory_space<vmem>>) attributes {dimension_semantics = [#tpu.dimension_semantics<parallel>], iteration_bounds = array<i64: 2>, scalar_prefetch = 0 : i64, scratch_operands = 2 : i64, tpu.core_type = #tpu.core_type<tc>, window_params = [{transform_indices = @transform_0, window_bounds = array<i64: 5>}, {pipeline_mode = #tpu.pipeline_mode<synchronous>, transform_indices = @transform_1, window_bounds = array<i64: 5, 256>}, {transform_indices = @transform_2, window_bounds = array<i64: 1, 4, 256>}, {transform_indices = @transform_3, window_bounds = array<i64: 1, 4, 256>}]} {
    %cst = arith.constant 0.000000e+00 : f32
    %0 = vector.broadcast %cst : f32 to vector<4x32xf32>
    %c0 = arith.constant 0 : index
    %c0_0 = arith.constant 0 : index
    %1 = vector.load %arg5[%c0, %c0_0] : memref<4x320xf32, #tpu.memory_space<vmem>>, vector<4x32xf32>
    tpu.vector_store %arg5[%c0, %c0_0], %0 {strides = array<i32>} : memref<4x320xf32, #tpu.memory_space<vmem>>, vector<4x32xf32>,
    %cst_1 = arith.constant 0.000000e+00 : f32
    %2 = vector.broadcast %cst_1 : f32 to vector<4x32xf32>
    %c0_2 = arith.constant 0 : index
    %c288 = arith.constant 288 : index
    %3 = vector.load %arg5[%c0_2, %c288] : memref<4x320xf32, #tpu.memory_space<vmem>>, vector<4x32xf32>
    tpu.vector_store %arg5[%c0_2, %c288], %2 {strides = array<i32>} : memref<4x320xf32, #tpu.memory_space<vmem>>, vector<4x32xf32>,
    %c0_3 = arith.constant 0 : index
    %c0_4 = arith.constant 0 : index
    %c0_5 = arith.constant 0 : index
    %4 = vector.load %arg3[%c0_3, %c0_4, %c0_5] : memref<1x4x256xf32, #tpu.memory_space<vmem>>, vector<1x4x256xf32>
    %5 = vector.shape_cast %4 : vector<1x4x256xf32> to vector<4x256xf32>
    %c0_6 = arith.constant 0 : index
    %c32 = arith.constant 32 : index
    %6 = vector.load %arg5[%c0_6, %c32] : memref<4x320xf32, #tpu.memory_space<vmem>>, vector<4x256xf32>
    tpu.vector_store %arg5[%c0_6, %c32], %5 {strides = array<i32>} : memref<4x320xf32, #tpu.memory_space<vmem>>, vector<4x256xf32>,
    %cst_7 = arith.constant 0.000000e+00 : f32
    %7 = vector.broadcast %cst_7 : f32 to vector<4x256xf32>
    %c0_8 = arith.constant 0 : index
    %8 = memref.load %arg1[%c0_8] : memref<5xf32, #tpu.memory_space<smem>>
    %c0_9 = arith.constant 0 : index
    %c0_10 = arith.constant 0 : index
    %9 = vector.load %arg5[%c0_9, %c0_10] : memref<4x320xf32, #tpu.memory_space<vmem>>, vector<4x256xf32>
    %10 = vector.broadcast %8 : f32 to vector<4x256xf32>
    %11 = arith.mulf %10, %9 : vector<4x256xf32>
    %12 = arith.addf %7, %11 : vector<4x256xf32>
    %c1 = arith.constant 1 : index
    %13 = memref.load %arg1[%c1] : memref<5xf32, #tpu.memory_space<smem>>
    %c0_11 = arith.constant 0 : index
    %c16 = arith.constant 16 : index
    %14 = vector.load %arg5[%c0_11, %c16] : memref<4x320xf32, #tpu.memory_space<vmem>>, vector<4x256xf32>
    %15 = vector.broadcast %13 : f32 to vector<4x256xf32>
    %16 = arith.mulf %15, %14 : vector<4x256xf32>
    %17 = arith.addf %12, %16 : vector<4x256xf32>
    %c2 = arith.constant 2 : index
    %18 = memref.load %arg1[%c2] : memref<5xf32, #tpu.memory_space<smem>>
    %c0_12 = arith.constant 0 : index
    %c32_13 = arith.constant 32 : index
    %19 = vector.load %arg5[%c0_12, %c32_13] : memref<4x320xf32, #tpu.memory_space<vmem>>, vector<4x256xf32>
    %20 = vector.broadcast %18 : f32 to vector<4x256xf32>
    %21 = arith.mulf %20, %19 : vector<4x256xf32>
    %22 = arith.addf %17, %21 : vector<4x256xf32>
    %c3 = arith.constant 3 : index
    %23 = memref.load %arg1[%c3] : memref<5xf32, #tpu.memory_space<smem>>
    %c0_14 = arith.constant 0 : index
    %c48 = arith.constant 48 : index
    %24 = vector.load %arg5[%c0_14, %c48] : memref<4x320xf32, #tpu.memory_space<vmem>>, vector<4x256xf32>
    %25 = vector.broadcast %23 : f32 to vector<4x256xf32>
    %26 = arith.mulf %25, %24 : vector<4x256xf32>
    %27 = arith.addf %22, %26 : vector<4x256xf32>
    %c4 = arith.constant 4 : index
    %28 = memref.load %arg1[%c4] : memref<5xf32, #tpu.memory_space<smem>>
    %c0_15 = arith.constant 0 : index
    %c64 = arith.constant 64 : index
    %29 = vector.load %arg5[%c0_15, %c64] : memref<4x320xf32, #tpu.memory_space<vmem>>, vector<4x256xf32>
    %30 = vector.broadcast %28 : f32 to vector<4x256xf32>
    %31 = arith.mulf %30, %29 : vector<4x256xf32>
    %32 = arith.addf %27, %31 : vector<4x256xf32>
    %cst_16 = arith.constant 0.000000e+00 : f32
    %33 = vector.broadcast %cst_16 : f32 to vector<4x2xf32>
    %c0_17 = arith.constant 0 : index
    %c0_18 = arith.constant 0 : index
    %34 = vector.load %arg6[%c0_17, %c0_18] : memref<4x260xf32, #tpu.memory_space<vmem>>, vector<4x2xf32>
    tpu.vector_store %arg6[%c0_17, %c0_18], %33 {strides = array<i32>} : memref<4x260xf32, #tpu.memory_space<vmem>>, vector<4x2xf32>,
    %cst_19 = arith.constant 0.000000e+00 : f32
    %35 = vector.broadcast %cst_19 : f32 to vector<4x2xf32>
    %c0_20 = arith.constant 0 : index
    %c258 = arith.constant 258 : index
    %36 = vector.load %arg6[%c0_20, %c258] : memref<4x260xf32, #tpu.memory_space<vmem>>, vector<4x2xf32>
    tpu.vector_store %arg6[%c0_20, %c258], %35 {strides = array<i32>} : memref<4x260xf32, #tpu.memory_space<vmem>>, vector<4x2xf32>,
    %c0_21 = arith.constant 0 : index
    %c2_22 = arith.constant 2 : index
    %37 = vector.load %arg6[%c0_21, %c2_22] : memref<4x260xf32, #tpu.memory_space<vmem>>, vector<4x256xf32>
    tpu.vector_store %arg6[%c0_21, %c2_22], %32 {strides = array<i32>} : memref<4x260xf32, #tpu.memory_space<vmem>>, vector<4x256xf32>,
    %cst_23 = arith.constant 0.000000e+00 : f32
    %38 = vector.broadcast %cst_23 : f32 to vector<4x256xf32>
    %c0_24 = arith.constant 0 : index
    %c0_25 = arith.constant 0 : index
    %39 = vector.load %arg2[%c0_24, %c0_25] : memref<5x256xf32, #tpu.memory_space<vmem>>, vector<1x256xf32>
    %c0_26 = arith.constant 0 : index
    %c0_27 = arith.constant 0 : index
    %40 = vector.load %arg6[%c0_26, %c0_27] : memref<4x260xf32, #tpu.memory_space<vmem>>, vector<4x256xf32>
    %41 = vector.broadcast %39 : vector<1x256xf32> to vector<4x256xf32>
    %42 = arith.mulf %41, %40 : vector<4x256xf32>
    %43 = arith.addf %38, %42 : vector<4x256xf32>
    %c1_28 = arith.constant 1 : index
    %c0_29 = arith.constant 0 : index
    %44 = vector.load %arg2[%c1_28, %c0_29] : memref<5x256xf32, #tpu.memory_space<vmem>>, vector<1x256xf32>
    %c0_30 = arith.constant 0 : index
    %c1_31 = arith.constant 1 : index
    %45 = vector.load %arg6[%c0_30, %c1_31] : memref<4x260xf32, #tpu.memory_space<vmem>>, vector<4x256xf32>
    %46 = vector.broadcast %44 : vector<1x256xf32> to vector<4x256xf32>
    %47 = arith.mulf %46, %45 : vector<4x256xf32>
    %48 = arith.addf %43, %47 : vector<4x256xf32>
    %c2_32 = arith.constant 2 : index
    %c0_33 = arith.constant 0 : index
    %49 = vector.load %arg2[%c2_32, %c0_33] : memref<5x256xf32, #tpu.memory_space<vmem>>, vector<1x256xf32>
    %c0_34 = arith.constant 0 : index
    %c2_35 = arith.constant 2 : index
    %50 = vector.load %arg6[%c0_34, %c2_35] : memref<4x260xf32, #tpu.memory_space<vmem>>, vector<4x256xf32>
    %51 = vector.broadcast %49 : vector<1x256xf32> to vector<4x256xf32>
    %52 = arith.mulf %51, %50 : vector<4x256xf32>
    %53 = arith.addf %48, %52 : vector<4x256xf32>
    %c3_36 = arith.constant 3 : index
    %c0_37 = arith.constant 0 : index
    %54 = vector.load %arg2[%c3_36, %c0_37] : memref<5x256xf32, #tpu.memory_space<vmem>>, vector<1x256xf32>
    %c0_38 = arith.constant 0 : index
    %c3_39 = arith.constant 3 : index
    %55 = vector.load %arg6[%c0_38, %c3_39] : memref<4x260xf32, #tpu.memory_space<vmem>>, vector<4x256xf32>
    %56 = vector.broadcast %54 : vector<1x256xf32> to vector<4x256xf32>
    %57 = arith.mulf %56, %55 : vector<4x256xf32>
    %58 = arith.addf %53, %57 : vector<4x256xf32>
    %c4_40 = arith.constant 4 : index
    %c0_41 = arith.constant 0 : index
    %59 = vector.load %arg2[%c4_40, %c0_41] : memref<5x256xf32, #tpu.memory_space<vmem>>, vector<1x256xf32>
    %c0_42 = arith.constant 0 : index
    %c4_43 = arith.constant 4 : index
    %60 = vector.load %arg6[%c0_42, %c4_43] : memref<4x260xf32, #tpu.memory_space<vmem>>, vector<4x256xf32>
    %61 = vector.broadcast %59 : vector<1x256xf32> to vector<4x256xf32>
    %62 = arith.mulf %61, %60 : vector<4x256xf32>
    %63 = arith.addf %58, %62 : vector<4x256xf32>
    %c0_44 = arith.constant 0 : index
    %c0_45 = arith.constant 0 : index
    %c0_46 = arith.constant 0 : index
    %64 = vector.load %arg4[%c0_44, %c0_45, %c0_46] : memref<1x4x256xf32, #tpu.memory_space<vmem>>, vector<1x4x256xf32>
    %65 = vector.shape_cast %64 : vector<1x4x256xf32> to vector<4x256xf32>
    %66 = vector.shape_cast %63 : vector<4x256xf32> to vector<1x4x256xf32>
    tpu.vector_store %arg4[%c0_44, %c0_45, %c0_46], %66 {strides = array<i32>} : memref<1x4x256xf32, #tpu.memory_space<vmem>>, vector<1x4x256xf32>,
    return
  }
  func.func @transform_0(%arg0: i32) -> i32 {
    %c0_i32 = arith.constant 0 : i32
    %c0_i32_0 = arith.constant 0 : i32
    return %c0_i32 : i32
  }
  func.func @transform_1(%arg0: i32) -> (i32, i32) {
    %c0_i32 = arith.constant 0 : i32
    %c0_i32_0 = arith.constant 0 : i32
    %c0_i32_1 = arith.constant 0 : i32
    return %c0_i32, %c0_i32_0 : i32, i32
  }
  func.func @transform_2(%arg0: i32) -> (i32, i32, i32) {
    %c0_i32 = arith.constant 0 : i32
    %c0_i32_0 = arith.constant 0 : i32
    %c0_i32_1 = arith.constant 0 : i32
    return %arg0, %c0_i32, %c0_i32_0 : i32, i32, i32
  }
  func.func @transform_3(%arg0: i32) -> (i32, i32, i32) {
    %c0_i32 = arith.constant 0 : i32
    %c0_i32_0 = arith.constant 0 : i32
    %c0_i32_1 = arith.constant 0 : i32
    return %arg0, %c0_i32, %c0_i32_0 : i32, i32, i32
  }
}

</mosaic_0001>

<bundles_post_ra>
// kernel: tpu_custom_call.1
= control target key start
LH: loop header
LB: loop body
LE: loop exit
PB: predicated region body
PF: predicated region fallthrough
CT: control target
= control target key end

     0   :  { %8 = vsyncpa [#allocation7], 0  ;;  %s1044_s0 = inlined_call_operand.hbm [shape: f32[5], index: 0, kind: input, shape index: {}]   ;;  %s1045_s1 = inlined_call_operand.hbm [shape: f32[5,256], index: 1, kind: input, shape index: {}]   ;;  %s1046_s2 = inlined_call_operand.hbm [shape: f32[2,4,256], index: 2, kind: input, shape index: {}]   ;;  %s1047_s3 = inlined_call_operand.hbm [shape: f32[2,4,256], index: 3, kind: output, shape index: {}]  }
   0x1   :  { %9 = vsyncpa [#allocation5], 0 }
   0x2   :  { %10 = vsyncpa [#allocation10], 0 }
   0x3   :  { %12 = vsyncpa [#allocation10 + $0x1], 0 }
   0x4   :  { %13 = vsyncpa [#allocation6], 0 }
   0x5   :  { %15 = vsyncpa [#allocation6 + $0x1], 0  ;;  %s876_s12 = smov 0   ;;  %s878_s13 = smov 0  }
   0x6   :  { %s880_s14 = smov 0   ;;  %s882_s15 = smov 0  }
   0x7 LB: > { %s897_s16 = sadd.s32 4294967295, %s841_s15   ;;  %s590_s17 = sadd.s32 4294967294, %s841_s15   ;;  %s841_s15 = sphi %s882_s15, %s1057_s15   ;;  %s837_s14 = sphi %s880_s14, %s1056_s14   ;;  %s833_s13 = sphi %s878_s13, %s1055_s13   ;;  %s829_s12 = sphi %s876_s12, %s1054_s12  }
   0x8   : > { %p83_p0 = scmp.ne.s32.totalorder %s833_s13, %s829_s12  ;;  %p84_p1 = scmp.eq.s32.totalorder %s897_s16, 0 }
   0x9   : > { %p107_p2 = scmp.eq.s32.totalorder %s897_s16, 1  ;;  %p113_p3 = scmp.eq.s32.totalorder %s590_s17, 1 }
   0xa   : > { %p906_p4 = por %p84_p1, %p83_p0  ;;  %p591_p5 = scmp.ge.s32.totalorder %s841_s15, 1 }
   0xb   : > { %p911_p6 = por %p113_p3, %p83_p0  ;;  %p120_p7 = scmp.lt.s32.totalorder %s841_s15, 3 }
   0xc   : > { %s132_s22 = sshll.u32 %s1044_s0, 4  ;;  %s142_s26 = sshll.u32 %s1045_s1, 4  ;;  %s133_s22 = int_to_ptr.hbm [resolvable:$true] %s132_s22  ;;  %s143_s26 = int_to_ptr.hbm [resolvable:$true] %s142_s26 }
   0xd   : > { %p919_p8 = pnand %p591_p5, %p120_p7  ;;  %s843_s27 = smov [#allocation8]  }
   0xe   : > { %s144_s28 = sshll.u32 %s843_s27, 4  ;;  %s844_s29 = smov [#allocation4]   ;;  %s145_s28 = int_to_ptr.vmem [resolvable:$true] %s144_s28 }
   0xf   : > { %p626_p10 = pneg %p919_p8  ;;  %s932_s30 = sadd.s32 1, %s841_s15  }
  0x10   : > { %s70_s4 = sadd.s32 1, %s837_s14  ;;  %s67_s5 = ssub.s32 %s841_s15, %s932_s30 }
  0x11   : > { %p627_p11 = pnand %p626_p10, %p84_p1  ;;  %p77_p12 = scmp.ne.s32.totalorder %s837_s14, %s833_s13 }
  0x12   : > { %p68_p13 = scmp.eq.s32.totalorder %s67_s5, 0  ;;  %p78_p0 = scmp.eq.s32.totalorder %s841_s15, 0 }
  0x13   : > { %629 = dma.hbm_to_smem (!%p627_p11), %s133_s22, 16, %s844_s29, [#allocation7]  }
  0x14   : > { %632 = dma.hbm_to_vmem [thread:$0]  (!%p627_p11), %s143_s26, 256, %s145_s28, [#allocation5]  }
  0x15   : > { %p942_p3 = por %p107_p2, %p77_p12  ;;  %p643_p5 = scmp.lt.s32.totalorder %s841_s15, 2 }
  0x16   : > { %s948_s7 = scalar_select %p68_p13, %s837_s14, %s70_s4  }
  0x17   : > { %p79_p7 = por %p78_p0, %p77_p12  ;;  %s155_s8 = sand.u32 1, %s837_s14  }
  0x18   : > { %s595_s9 = sshll.u32 %s155_s8, 3  ;;  %s612_s10 = sshll.u32 %s841_s15, 3 }
  0x19   : > { %s164_s20 = scalar_lea.hbm %s1046_s2, %s612_s10  ;;  %s159_s21 = scalar_lea.vmem [#allocation9], %s595_s9 }
  0x1a   : > { %s168_s22 = sshll.u32 %s159_s21, 4  ;;  %s166_s24 = sshll.u32 %s164_s20, 4  ;;  %s169_s22 = int_to_ptr.vmem [resolvable:$true] %s168_s22  ;;  %s167_s24 = int_to_ptr.hbm [resolvable:$true] %s166_s24 }
  0x1b   : > { %p955_p2 = pnand %p643_p5, %p79_p7  ;;  %s156_s26 = scalar_lea.sflag [#allocation10], %s155_s8 }
  0x1c   : > { %s737_s27 = sshra.s32 %s167_s24, 4  ;;  %s744_s5 = scalar_lea.hbm %s1046_s2, 16  ;;  %s738_s27 = int_to_ptr.hbm [resolvable:$true] %s737_s27 }
  0x1d   : > { %s739_s28 = scalar_lea.hbm %s738_s27, 8  ;;  %p741_p11 = pneg %p955_p2 }
  0x1e   : > { %p740_p10 = scmp.ne.s32.totalorder %s738_s27, %s739_s28  ;;  %p745_p0 = scmp.lt.s32.totalorder %s738_s27, %s1046_s2 }
  0x1f   : > { %p746_p5 = scmp.lt.s32.totalorder %s744_s5, %s739_s28 }
  0x20   : > { %p742_p12 = pnand %p741_p11, %p740_p10 }
  0x21   : > { %p747_p7 = por %p746_p5, %p745_p0 }
  0x22   : > { %p743_p13 = pneg %p742_p12 }
  0x24   : > { %p748_p9 = pnand %p747_p7, %p743_p13 }
  0x26   : > { %751 = shalt.err (!%p748_p9)
}
  0x27   : > { %636 = dma.hbm_to_vmem [thread:$0]  (!%p955_p2), %s167_s24, 128, %s169_s22, %s156_s26  }
  0x28   : > { %177 = sbr.rel (%p919_p8) target bundleno = 612 (0x264), region = 32 }
  0x2d   : > { %812 = dma.done.wait (%p84_p1), [#allocation7], 16  }
  0x2e   : > { %814 = vsyncadd (%p84_p1), [#allocation7], 4294967280 }
  0x2f   : > { %816 = dma.done.wait (%p84_p1), [#allocation5], 256  }
  0x30   : > { %818 = vsyncadd (%p84_p1), [#allocation5], 4294967040  ;;  %s980_s8 = sand.u32 1, %s833_s13  }
  0x31   : > { %s601_s23 = sshll.u32 %s980_s8, 3  ;;  %s190_s11 = scalar_lea.sflag [#allocation10], %s980_s8 }
  0x32   : > { %s193_s17 = scalar_lea.vmem [#allocation9], %s601_s23 }
  0x33   : > { %820 = dma.done.wait (%p906_p4), %s190_s11, 128  }
  0x34   : > { %822 = vsyncadd (%p906_p4), %s190_s11, 4294967168 }
  0x35   : > { %199 = sfence }
  0x36   : > { %v222_v0 = vld [vmem:[%s193_s17] sm:$0xff]  ;;  %s845_s20 = smov 32   ;;  %vm218_vm0 = vcmask 257024   ;;  %vm220_vm1 = vcmask 519424   ;;  %v846_v1 = vmov 0.0   ;;  %vm231_vm2 = vcmask 1043712  }
  0x37   : > { %224 = vrot.lane.b32.xlu0 %v222_v0, %s845_s20  ;;  %219 = vst.msk [vmem:[#allocation2] sm:$0xf] %vm218_vm0, %v846_v1  ;;  %vm232_vm3 = vcmask 1047556   ;;  %s604_s21 = sld [smem:[#allocation4 + $0x2]]  ;;  %vm227_vm4 = vcmask 261120   ;;  %s847_s24 = smov 96  }
  0x38   : > { %221 = vst.msk [vmem:[#allocation2 + $0x8] sm:$0xf] %vm220_vm1, %v846_v1  ;;  %s603_s22 = sld [smem:[#allocation4 + $0x1]]  ;;  %vm233_vm5 = vmor %vm232_vm3, %vm231_vm2  ;;  %s848_s25 = smov 112   ;;  %vm312_vm6 = vcmask 11264   ;;  %vm314_vm7 = vcmask 27664  }
  0x39   : > { %s605_s18 = sld [smem:[#allocation4 + $0x3]]  ;;  %s849_s27 = smov 80   ;;  %313 = vst.msk [vmem:[#allocation3] sm:$0xf] %vm312_vm6, %v846_v1  ;;  %vm255_vm8 = vcmask 1043456   ;;  %vm257_vm9 = vcmask 916480  }
  0x3a   : > { %s606_s26 = sld [smem:[#allocation4 + $0x4]]  ;;  %s850_s28 = smov 64   ;;  %315 = vst.msk [vmem:[#allocation3 + $0x8] sm:$0xf] %vm314_vm7, %v846_v1  ;;  %vm274_vm10 = vcmask 785408   ;;  %vm291_vm11 = vcmask 654336  }
  0x3b   : > { %s236_s29 = sld [smem:[#allocation4]]  ;;  %vm308_vm12 = vcmask 523264   ;;  %s851_s4 = smov 2   ;;  %vm324_vm13 = vcmask 1043472   ;;  %vm320_vm14 = vcmask 15360   ;;  %vm400_vm1 = vcmask 1031168  }
  0x3c   : > { %vm325_vm15 = vmor %vm232_vm3, %vm324_vm13  ;;  %s852_s5 = smov 127   ;;  %s853_s9 = smov 126   ;;  %vm432_vm2 = vcmask 1022976   ;;  %vm464_vm3 = vcmask 1014784  }
  0x3d   : > { %v262_v5 = vstv %s604_s21  ;;  %s854_s10 = smov 125   ;;  %s855_s11 = smov 124  }
  0x3e   : > { %v244_v6 = vstv %s603_s22  ;;  %s613_s17 = sshll.u32 %s897_s16, 3  ;;  %s217_s16 = scalar_lea.vmem [#allocation11], %s601_s23 }
  0x3f   : > { %v279_v12 = vstv %s605_s18  ;;  %s491_s22 = scalar_lea.hbm %s1047_s3, %s613_s17  ;;  %s493_s18 = sshll.u32 %s217_s16, 4  ;;  %s494_s18 = int_to_ptr.vmem [resolvable:$true] %s493_s18 }
  0x40   : > { %v296_v16 = vstv %s606_s26  ;;  %s787_s23 = scalar_lea.hbm %s1047_s3, 16 }
  0x41   : > { %v238_v26 = vstv %s236_s29 }
  0xa9   : > { %v225_v2 = vpop.permute.xlu0 %224 }
  0xaa   : > { %v226_v3 = vrot.slane %v225_v2, 4 }
  0xac   : > { %v228_v4 = vsel %vm227_vm4, %v226_v3, %v225_v2  ;;  %235 = vst.msk [vmem:[#allocation2 + $0x8] sm:$0xf] %vm218_vm0, %v226_v3  ;;  %vm368_vm0 = vcmask 1039360  }
  0xad   : > { %234 = vst.msk [vmem:[#allocation2] sm:$0xff] %vm233_vm5, %v228_v4 }
  0xb3   : > { %v243_v7 = vld [vmem:[#allocation2 + $0x8] sm:$0xf] }
  0xb4   : > { %v264_v8 = vmul.f32 %v262_v5, %v243_v7  ;;  %v242_v9 = vld [vmem:[#allocation2] sm:$0xff]  ;;  %v246_v10 = vmul.f32 %v244_v6, %v243_v7  ;;  %v281_v15 = vmul.f32 %v279_v12, %v243_v7  ;;  %v298_v17 = vmul.f32 %v296_v16, %v243_v7 }
  0xb5   : > { %v245_v11 = vmul.f32 %v244_v6, %v242_v9  ;;  %v263_v13 = vmul.f32 %v262_v5, %v242_v9  ;;  %v280_v14 = vmul.f32 %v279_v12, %v242_v9  ;;  %v297_v18 = vmul.f32 %v296_v16, %v242_v9  ;;  %v378_v16 = vld [vmem:[#allocation8 + $0x2] ss:$8 sm:$0x3] }
  0xb6   : > { %269 = vrot.lane.b32.xlu2 %v264_v8, %s847_s24  ;;  %251 = vrot.lane.b32.xlu1 %v246_v10, %s848_s25  ;;  %v239_v34 = vmul.f32 %v242_v9, %v238_v26 }
  0xb7   : > { %249 = vrot.lane.b32.xlu0 %v245_v11, %s848_s25  ;;  %s480_s25 = scalar_lea.sflag [#allocation6], %s980_s8 }
  0xbe   : > { %284 = vrot.lane.b32.xlu2 %v280_v14, %s849_s27  ;;  %267 = vrot.lane.b32.xlu1 %v263_v13, %s847_s24  ;;  %v346_v13 = vld [vmem:[#allocation8 + $0x1] ss:$8 sm:$0x3]  ;;  %s495_s24 = sshll.u32 %s491_s22, 4  ;;  %s496_s24 = int_to_ptr.hbm [resolvable:$true] %s495_s24 }
  0xbf   : > { %286 = vrot.lane.b32.xlu0 %v281_v15, %s849_s27  ;;  %v328_v15 = vld [vmem:[#allocation8] ss:$8 sm:$0x3]  ;;  %s781_s26 = sshra.s32 %s496_s24, 4  ;;  %s782_s26 = int_to_ptr.hbm [resolvable:$true] %s781_s26 }
  0xc0   : > { %s783_s27 = scalar_lea.hbm %s782_s26, 8  ;;  %p788_p9 = scmp.lt.s32.totalorder %s782_s26, %s1047_s3 }
  0xc1   : > { %p784_p1 = scmp.ne.s32.totalorder %s782_s26, %s783_s27  ;;  %p789_p2 = scmp.lt.s32.totalorder %s787_s23, %s783_s27 }
  0xc3   : > { %p785_p4 = pnand %p784_p1, %p942_p3  ;;  %p790_p10 = por %p789_p2, %p788_p9 }
  0xc5   : > { %p786_p8 = pneg %p785_p4 }
  0xc6   : > { %303 = vrot.lane.b32.xlu2 %v298_v17, %s850_s28  ;;  %301 = vrot.lane.b32.xlu1 %v297_v18, %s850_s28  ;;  %v351_v17 = vperm.slane %v346_v13, 1 }
  0xc7   : > { %p791_p11 = pnand %p790_p10, %p786_p8 }
 0x110   : > { %v270_v19 = vpop.permute.xlu2 %269 }
 0x111   : > { %v272_v28 = vrot.slane %v270_v19, 4  ;;  %v410_v19 = vld [vmem:[#allocation8 + $0x3] ss:$8 sm:$0x3] }
 0x118   : > { %v285_v24 = vpop.permute.xlu2 %284 }
 0x119   : > { %v288_v33 = vrot.slane %v285_v24, 4 }
 0x120   : > { %v304_v39 = vpop.permute.xlu2 %303 }
 0x121   : > { %v306_v43 = vrot.slane %v304_v39, 4 }
 0x128   : > { %v252_v20 = vpop.permute.xlu1 %251 }
 0x129   : > { %v250_v21 = vpop.permute.xlu0 %249  ;;  %v254_v22 = vrot.slane %v252_v20, 4  ;;  %v332_v20 = vperm.slane %v328_v15, 1 }
 0x12a   : > { %v253_v23 = vrot.slane %v250_v21, 4 }
 0x12c   : > { %v256_v25 = vsel %vm255_vm8, %v253_v23, %v254_v22  ;;  %v383_v22 = vperm.slane %v378_v16, 1 }
 0x12d   : > { %v258_v31 = vsel %vm257_vm9, %v250_v21, %v256_v25  ;;  %v350_v21 = vperm.slane %v346_v13, 0  ;;  %v331_v25 = vperm.slane %v328_v15, 0 }
 0x12e   : > { %v260_v37 = vadd.f32 %v258_v31, %v239_v34  ;;  %v442_v31 = vld [vmem:[#allocation8 + $0x4] ss:$8 sm:$0x3] }
 0x130   : > { %v268_v27 = vpop.permute.xlu1 %267 }
 0x131   : > { %v271_v29 = vrot.slane %v268_v27, 4  ;;  %v287_v30 = vpop.permute.xlu0 %286 }
 0x132   : > { %v289_v32 = vrot.slane %v287_v30, 4  ;;  %v415_v30 = vperm.slane %v410_v19, 1 }
 0x133   : > { %v273_v35 = vsel %vm255_vm8, %v271_v29, %v272_v28  ;;  %v382_v29 = vperm.slane %v378_v16, 0 }
 0x134   : > { %v275_v36 = vsel %vm274_vm10, %v268_v27, %v273_v35  ;;  %v290_v38 = vsel %vm255_vm8, %v288_v33, %v289_v32 }
 0x135   : > { %v277_v40 = vadd.f32 %v275_v36, %v260_v37  ;;  %v292_v42 = vsel %vm291_vm11, %v285_v24, %v290_v38  ;;  %v414_v37 = vperm.slane %v410_v19, 0 }
 0x137   : > { %v294_v45 = vadd.f32 %v292_v42, %v277_v40  ;;  %v447_v40 = vperm.slane %v442_v31, 1 }
 0x138   : > { %v302_v41 = vpop.permute.xlu1 %301 }
 0x139   : > { %v305_v44 = vrot.slane %v302_v41, 4 }
 0x13b   : > { %v307_v46 = vsel %vm255_vm8, %v305_v44, %v306_v43  ;;  %v446_v44 = vperm.slane %v442_v31, 0 }
 0x13c   : > { %v309_v47 = vsel %vm308_vm12, %v302_v41, %v307_v46 }
 0x13d   : > { %v311_v48 = vadd.f32 %v309_v47, %v294_v45 }
 0x13f   : > { %317 = vrot.lane.b32.xlu0 %v311_v48, %s851_s4 }
 0x1b1   : > { %v318_v49 = vpop.permute.xlu0 %317 }
 0x1b2   : > { %v319_v50 = vrot.slane %v318_v49, 4 }
 0x1b4   : > { %v321_v51 = vsel %vm320_vm14, %v319_v50, %v318_v49  ;;  %327 = vst.msk [vmem:[#allocation3 + $0x8] sm:$0xf] %vm312_vm6, %v319_v50 }
 0x1b5   : > { %326 = vst.msk [vmem:[#allocation3] sm:$0xff] %vm325_vm15, %v321_v51 }
 0x1bb   : > { %v348_v52 = vld [vmem:[#allocation3 + $0x8] sm:$0xf] }
 0x1bc   : > { %v329_v53 = vld [vmem:[#allocation3] sm:$0xff]  ;;  %358 = vst [vmem:[#allocation1 + $0x10] ss:$2 sm:$0xff] %v348_v52  ;;  %v380_v55 = vld [vmem:[#allocation3 + $0x8] sm:$0xf] }
 0x1bd   : > { %336 = vst [vmem:[#allocation1] ss:$2 sm:$0xff] %v329_v53  ;;  %v412_v59 = vld [vmem:[#allocation3 + $0x8] sm:$0xf] }
 0x1be   : > { %v444_v63 = vld [vmem:[#allocation3 + $0x8] sm:$0xf] }
 0x1c3   : > { %v361_v54 = vld.sshfl [vmem:[#allocation1 + $0x10] sm:$0xff pattern:$0x75316420] }
 0x1c4   : > { %366 = vrot.lane.b32.xlu2 %v361_v54, %s852_s5  ;;  %390 = vst [vmem:[#allocation1 + $0x10] ss:$2 sm:$0xff] %v380_v55  ;;  %v998_v56 = vld.sshfl [vmem:[#allocation1] sm:$0xff pattern:$0x75316420] }
 0x1c5   : > { %v1000_v57 = vld.sshfl [vmem:[#allocation1 + $0x8] sm:$0xff pattern:$0x75316420]  ;;  %v341_v38 = vmul.f32 %v998_v56, %v331_v25 }
 0x1c6   : > { %356 = vst [vmem:[#allocation1] ss:$2 sm:$0xff] %v329_v53  ;;  %v342_v34 = vmul.f32 %v1000_v57, %v332_v20 }
 0x1cb   : > { %v393_v58 = vld.sshfl [vmem:[#allocation1 + $0x10] sm:$0xff pattern:$0x75316420] }
 0x1cc   : > { %398 = vrot.lane.b32.xlu2 %v393_v58, %s853_s9  ;;  %422 = vst [vmem:[#allocation1 + $0x10] ss:$2 sm:$0xff] %v412_v59 }
 0x1cd   : > { %v360_v60 = vld.sshfl [vmem:[#allocation1 + $0x8] sm:$0xff pattern:$0x75316420]  ;;  %v359_v61 = vld.sshfl [vmem:[#allocation1] sm:$0xff pattern:$0x75316420] }
 0x1ce   : > { %364 = vrot.lane.b32.xlu1 %v360_v60, %s852_s5  ;;  %362 = vrot.lane.b32.xlu0 %v359_v61, %s852_s5  ;;  %388 = vst [vmem:[#allocation1] ss:$2 sm:$0xff] %v329_v53 }
 0x1d3   : > { %v425_v62 = vld.sshfl [vmem:[#allocation1 + $0x10] sm:$0xff pattern:$0x75316420] }
 0x1d4   : > { %430 = vrot.lane.b32.xlu2 %v425_v62, %s854_s10  ;;  %454 = vst [vmem:[#allocation1 + $0x10] ss:$2 sm:$0xff] %v444_v63 }
 0x1d5   : > { %v392_v0 = vld.sshfl [vmem:[#allocation1 + $0x8] sm:$0xff pattern:$0x75316420]  ;;  %v391_v1 = vld.sshfl [vmem:[#allocation1] sm:$0xff pattern:$0x75316420] }
 0x1d6   : > { %396 = vrot.lane.b32.xlu1 %v392_v0, %s853_s9  ;;  %394 = vrot.lane.b32.xlu0 %v391_v1, %s853_s9  ;;  %420 = vst [vmem:[#allocation1] ss:$2 sm:$0xff] %v329_v53 }
 0x1db   : > { %v457_v2 = vld.sshfl [vmem:[#allocation1 + $0x10] sm:$0xff pattern:$0x75316420] }
 0x1dc   : > { %462 = vrot.lane.b32.xlu2 %v457_v2, %s855_s11 }
 0x1dd   : > { %v424_v3 = vld.sshfl [vmem:[#allocation1 + $0x8] sm:$0xff pattern:$0x75316420]  ;;  %v423_v4 = vld.sshfl [vmem:[#allocation1] sm:$0xff pattern:$0x75316420] }
 0x1de   : > { %428 = vrot.lane.b32.xlu1 %v424_v3, %s854_s10  ;;  %426 = vrot.lane.b32.xlu0 %v423_v4, %s854_s10  ;;  %452 = vst [vmem:[#allocation1] ss:$2 sm:$0xff] %v329_v53 }
 0x1e5   : > { %v456_v5 = vld.sshfl [vmem:[#allocation1 + $0x8] sm:$0xff pattern:$0x75316420]  ;;  %v455_v6 = vld.sshfl [vmem:[#allocation1] sm:$0xff pattern:$0x75316420] }
 0x1e6   : > { %460 = vrot.lane.b32.xlu1 %v456_v5, %s855_s11  ;;  %458 = vrot.lane.b32.xlu0 %v455_v6, %s855_s11 }
 0x21e   : > { %v367_v7 = vpop.permute.xlu2 %366 }
 0x226   : > { %v399_v10 = vpop.permute.xlu2 %398 }
 0x22e   : > { %v431_v14 = vpop.permute.xlu2 %430 }
 0x236   : > { %v463_v45 = vpop.permute.xlu2 %462 }
 0x240   : > { %v365_v8 = vpop.permute.xlu1 %364  ;;  %v363_v9 = vpop.permute.xlu0 %362 }
 0x241   : > { %v370_v18 = vsel %vm368_vm0, %v365_v8, %v367_v7  ;;  %v369_v26 = vsel %vm368_vm0, %v363_v9, %v365_v8 }
 0x242   : > { %v374_v28 = vmul.f32 %v370_v18, %v351_v17  ;;  %v373_v35 = vmul.f32 %v369_v26, %v350_v21 }
 0x244   : > { %v376_v41 = vadd.f32 %v374_v28, %v342_v34  ;;  %v375_v46 = vadd.f32 %v373_v35, %v341_v38 }
 0x248   : > { %v397_v11 = vpop.permute.xlu1 %396  ;;  %v395_v12 = vpop.permute.xlu0 %394 }
 0x249   : > { %v402_v27 = vsel %vm400_vm1, %v397_v11, %v399_v10  ;;  %v401_v32 = vsel %vm400_vm1, %v395_v12, %v397_v11 }
 0x24a   : > { %v406_v36 = vmul.f32 %v402_v27, %v383_v22  ;;  %v405_v42 = vmul.f32 %v401_v32, %v382_v29 }
 0x24c   : > { %v408_v47 = vadd.f32 %v406_v36, %v376_v41  ;;  %v407_v53 = vadd.f32 %v405_v42, %v375_v46 }
 0x250   : > { %v429_v23 = vpop.permute.xlu1 %428  ;;  %v427_v24 = vpop.permute.xlu0 %426 }
 0x251   : > { %v434_v33 = vsel %vm432_vm2, %v429_v23, %v431_v14  ;;  %v433_v39 = vsel %vm432_vm2, %v427_v24, %v429_v23 }
 0x252   : > { %v438_v43 = vmul.f32 %v434_v33, %v415_v30  ;;  %v437_v48 = vmul.f32 %v433_v39, %v414_v37 }
 0x254   : > { %v440_v54 = vadd.f32 %v438_v43, %v408_v47  ;;  %v439_v57 = vadd.f32 %v437_v48, %v407_v53 }
 0x258   : > { %v461_v49 = vpop.permute.xlu1 %460  ;;  %v459_v50 = vpop.permute.xlu0 %458 }
 0x259   : > { %v466_v51 = vsel %vm464_vm3, %v461_v49, %v463_v45  ;;  %v465_v52 = vsel %vm464_vm3, %v459_v50, %v461_v49 }
 0x25a   : > { %v470_v55 = vmul.f32 %v466_v51, %v447_v40  ;;  %v469_v56 = vmul.f32 %v465_v52, %v446_v44 }
 0x25c   : > { %v472_v58 = vadd.f32 %v470_v55, %v440_v54  ;;  %v471_v60 = vadd.f32 %v469_v56, %v439_v57 }
 0x25e   : > { %v475_v59 = vrot.slane %v472_v58, 4 }
 0x260   : > { %v476_v61 = vsel %vm255_vm8, %v471_v60, %v475_v59 }
 0x261   : > { %478 = vst [vmem:[%s217_s16] sm:$0xff] %v476_v61 }
 0x262   : > { %794 = shalt.err (!%p791_p11)
}
 0x263   : > { %624 = dma.vmem_to_hbm [thread:$0]  (%p942_p3), %s494_s18, 128, %s496_s24, %s480_s25  }
 0x264 PF: > { %s507_s8 = sand.u32 1, %s829_s12   ;;  %p1053_p12 = scmp.ge.s32.totalorder %s841_s15, 2 }
 0x265   : > { %s508_s9 = scalar_lea.sflag [#allocation6], %s507_s8 }
 0x266   : > { %p638_p13 = pnand %p1053_p12, %p911_p6 }
 0x268   : > { %p639_p0 = pneg %p638_p13 }
 0x26a   : > { %824 = dma.done.wait (%p639_p0), %s508_s9, 128  }
 0x26b   : > { %826 = vsyncadd (%p639_p0), %s508_s9, 4294967168  ;;  %p18_p5 = scmp.ge.s32.totalorder %s932_s30, 4   ;;  %s1054_s12 = smov %s833_s13 }
 0x26c   : > { %s1055_s13 = smov %s837_s14  ;;  %s1056_s14 = smov %s948_s7 }
 0x26d   : > { %s1057_s15 = smov %s932_s30  ;;  %20 = sbr.rel (!%p18_p5) target bundleno = 7 (0x7), region = 95 }
 0x272   :  { %514 = vsyncpa [#allocation5], 1 }
 0x273   :  { %516 = vsyncpa [#allocation5 + $0x1], 1 }
 0x274   :  { %517 = vsyncpa [#allocation10], 1 }
 0x275   :  { %519 = vsyncpa [#allocation10 + $0x1], 1 }
 0x276   :  { %520 = vsyncpa [#allocation6], 1 }
 0x277   :  { %522 = vsyncpa [#allocation6 + $0x1], 1 }
 0x278   :  { %523 = vsyncpa [#allocation7], 1 }
 0x279   :  { %525 = vsyncpa [#allocation7 + $0x1], 1 }

</bundles_post_ra>
